<compile_context>
chip_gen: v5e
topology: v5e:2x2
jax: 0.10.0
libtpu: 0.0.40
codegen_flags: <defaults>
</compile_context>

<pallas_src>
import jax
import jax.numpy as jnp
from jax.experimental import pallas as pl
from jax.experimental.pallas import tpu as pltpu


# ---------------------------------------------------------------------------
# "Module init": sinusoidal table + folded coefficient tables (plain JAX,
# runs once, not in the forward hot path).
# ---------------------------------------------------------------------------
def build_sinusoidal_embeddings(max_seq_len: int, dim: int):
    """Replicates RoPEPositionEmbedding.build_sinusoidal_embeddings exactly."""
    even_i = jnp.arange(0, dim, 2, dtype=jnp.float32)            # i = 0, 2, 4, ...
    pos = jnp.arange(max_seq_len, dtype=jnp.float32)
    angle = pos[:, None] / jnp.power(jnp.float32(10000.0),
                                     2.0 * even_i / float(dim))[None, :]
    emb = jnp.zeros((max_seq_len, dim), jnp.float32)
    emb = emb.at[:, 0::2].set(jnp.sin(angle))
    emb = emb.at[:, 1::2].set(jnp.cos(angle))
    return emb


def _interleave(a, b):
    L, K = a.shape
    return jnp.stack([a, b], axis=-1).reshape(L, 2 * K)


def build_rope_tables(max_seq_len: int, dim: int, dtype=jnp.float32):
    """Precompute the two interleaved, sign-folded coefficient tables.

    Per lane i the forward becomes
        out[i] = x[i] * cos_full[i] + x[i ^ 1] * sin_comb[i]
    where x[i ^ 1] (the pair partner) is fetched in-kernel with two lane rolls
    and a parity select.  Tables are built ONCE in the working dtype so the
    forward pass never slices/casts them.
    """
    emb = build_sinusoidal_embeddings(max_seq_len, dim)
    ce = jnp.cos(emb[:, 0::2])            # cos(pos_emb[:, 0::2])   (L, dim//2)
    sn = jnp.sin(emb[:, 1::2])            # sin(pos_emb[:, 1::2])   (L, dim//2)
    cos_full = _interleave(ce, ce)        # multiplies x[i]
    sin_comb = _interleave(-sn, sn)       # multiplies the pair partner x[i ^ 1]
    return cos_full.astype(dtype), sin_comb.astype(dtype)


# ---------------------------------------------------------------------------
# Pallas kernel
# ---------------------------------------------------------------------------
def _rope_kernel(x_ref, cos_ref, sin_ref, o_ref):
    # x_ref / o_ref: (tile_b, tile_s, D) interleaved rows.
    # cos_ref / sin_ref: (tile_s, D) coefficient tiles (broadcast over batch).
    x = x_ref[...]
    last = x.ndim - 1
    # Pair-partner fetch: two static lane rotations + one lane-parity select.
    # Even lanes take x[i+1], odd lanes take x[i-1]; the wrapped lanes of each
    # roll are never selected, so correctness needs no zero-masking.
    x_next = jnp.roll(x, -1, axis=last)        # x_next[..., i] = x[..., i + 1]
    x_prev = jnp.roll(x, 1, axis=last)         # x_prev[..., i] = x[..., i - 1]
    lane = jax.lax.broadcasted_iota(jnp.int32, x.shape, last)
    x_pair = jnp.where(lane % 2 == 0, x_next, x_prev)
    o_ref[...] = x * cos_ref[...] + x_pair * sin_ref[...]


# ---------------------------------------------------------------------------
# Tiling / VMEM heuristics
# ---------------------------------------------------------------------------
def _round_up(n, m):
    return ((n + m - 1) // m) * m


def _vmem_budgets():
    """(vmem_limit_bytes, double-buffered block budget), per TPU generation."""
    vmem_cap = 64 * 1024 * 1024                       # conservative (v7x-sized) default
    try:
        info = pltpu.get_tpu_info()
        vmem_cap = int(getattr(info, "vmem_capacity_bytes", vmem_cap))
    except Exception:
        pass
    if vmem_cap >= 100 * 1024 * 1024:                 # v5e / v6e: 128 MiB physical VMEM
        return 64 * 1024 * 1024, 48 * 1024 * 1024
    return 32 * 1024 * 1024, 20 * 1024 * 1024         # v7x: 64 MiB physical VMEM


def _pick_tiles(B, S, D, itemsize, block_budget, seq_tile=None, batch_tile=None):
    # Sublane packing of the working dtype: 8 (f32), 16 (bf16), 32 (int8/fp8).
    sublane = max(8, 32 // max(int(itemsize), 1))
    row_bytes = D * int(itemsize)

    def footprint(tb, ts):
        # Double-buffered per-step footprint: x + out blocks (tb*ts rows each)
        # plus the two coefficient blocks (ts rows each).
        return 2 * (2 * tb + 2) * ts * row_bytes

    # --- seq tile ------------------------------------------------------------
    if seq_tile is not None:
        tile_s = min(int(seq_tile), S)
        if tile_s != S and tile_s % sublane != 0:
            raise ValueError(
                f"seq_tile={seq_tile} must be a multiple of {sublane} or >= seq_len={S}")
    elif S <= sublane:
        tile_s = S                                    # single full-dim block
    else:
        cap = (S // sublane) * sublane                # largest sublane multiple <= S
        want = block_budget // (2 * 4 * row_bytes)    # budget assuming tile_b = 1
        want = max(sublane, min(512, (want // sublane) * sublane))
        tile_s = min(want, cap)
        # Keep >= 2 seq steps when B == 1 so a parallel split (megacore /
        # v7x dual-TC) has balanced work.
        if B == 1 and pl.cdiv(S, tile_s) == 1:
            half = _round_up(pl.cdiv(S, 2), sublane)
            tile_s = max(sublane, min(half, cap))

    # --- batch tile ----------------------------------------------------------
    if batch_tile is not None:
        tile_b = max(1, min(int(batch_tile), B))
    else:
        tile_b = 1
        target = 2 * 1024 * 1024      # ~2 MiB of x per step: step overhead < ~1%
        if B > 1 and tile_s * row_bytes < target:
            tile_b = max(1, min(B, target // max(tile_s * row_bytes, 1)))
            while tile_b > 1 and footprint(tile_b, tile_s) > block_budget:
                tile_b -= 1
            # Keep the overall grid at >= 2 steps when possible.
            if pl.cdiv(S, tile_s) == 1 and tile_b >= B:
                tile_b = max(1, pl.cdiv(B, 2))
    return tile_b, tile_s


# ---------------------------------------------------------------------------
# Forward wrapper
# ---------------------------------------------------------------------------
def rope_position_embedding(x, cos_full, sin_comb, *, seq_tile=None, batch_tile=None):
    """RoPEPositionEmbedding.forward for x of shape (B, S, D).

    cos_full / sin_comb: the (max_seq_len, dim) tables from build_rope_tables,
    already in the working dtype.  Rows >= S are simply never fetched (no
    per-call slicing in the hot path).
    """
    B, S, D = x.shape
    L, Dt = cos_full.shape
    if D % 2 != 0:
        raise ValueError(f"dim must be even, got {D}")
    if S > L or D > Dt:
        raise ValueError(
            f"input (seq_len={S}, dim={D}) exceeds table (max_seq_len={L}, dim={Dt})")

    dtype = x.dtype
    # Rare fallback paths only; the hot path passes the prebuilt tables through
    # untouched (no extra HBM read+write passes before the kernel).
    if D != Dt:
        cos_full = cos_full[:, :D]
        sin_comb = sin_comb[:, :D]
    if cos_full.dtype != dtype:
        cos_full = cos_full.astype(dtype)
        sin_comb = sin_comb.astype(dtype)

    vmem_limit, block_budget = _vmem_budgets()
    itemsize = jnp.dtype(dtype).itemsize
    tile_b, tile_s = _pick_tiles(B, S, D, itemsize, block_budget,
                                 seq_tile=seq_tile, batch_tile=batch_tile)

    if tile_s < 8 and cos_full.shape[0] != S:
        # Tiny-sequence corner case (S < 8): make the table block equal the full
        # table rows so the (8, 128) block rule is satisfied.
        cos_full = cos_full[:S]
        sin_comb = sin_comb[:S]

    # Batch innermost: the coefficient block index is unchanged across
    # consecutive grid steps, so the tables are not re-fetched per batch block.
    grid = (pl.cdiv(S, tile_s), pl.cdiv(B, tile_b))

    x_spec = pl.BlockSpec((tile_b, tile_s, D), lambda s, b: (b, s, 0))
    tab_spec = pl.BlockSpec((tile_s, D), lambda s, b: (s, 0))

    return pl.pallas_call(
        _rope_kernel,
        out_shape=jax.ShapeDtypeStruct((B, S, D), dtype),
        grid_spec=pltpu.PrefetchScalarGridSpec(
            num_scalar_prefetch=0,
            grid=grid,
            in_specs=[x_spec, tab_spec, tab_spec],
            out_specs=x_spec,
        ),
        compiler_params=pltpu.CompilerParams(
            dimension_semantics=("parallel", "parallel"),
            vmem_limit_bytes=vmem_limit,
        ),
    )(x, cos_full, sin_comb)


# ---------------------------------------------------------------------------
# Pure-JAX reference (direct transcription of the PyTorch forward).
# ---------------------------------------------------------------------------
def rope_reference(x, emb):
    B, S, D = x.shape
    pe = emb[:S, :D][None]
    oe = x[:, :, 0::2] * jnp.cos(pe[:, :, 0::2]) - x[:, :, 1::2] * jnp.sin(pe[:, :, 1::2])
    oo = x[:, :, 0::2] * jnp.sin(pe[:, :, 1::2]) + x[:, :, 1::2] * jnp.cos(pe[:, :, 0::2])
    out = jnp.zeros_like(x)
    out = out.at[:, :, 0::2].set(oe)
    out = out.at[:, :, 1::2].set(oo)
    return out


if __name__ == "__main__":
    MAX_SEQ_LEN, DIM = 64, 128

    emb = build_sinusoidal_embeddings(MAX_SEQ_LEN, DIM)
    cos_f32, sin_f32 = build_rope_tables(MAX_SEQ_LEN, DIM, dtype=jnp.float32)

    key = jax.random.PRNGKey(0)

    # Case 1: small shapes, fully automatic tiling.
    x1 = jax.random.normal(key, (2, 16, DIM), dtype=jnp.float32)
    out1 = jax.block_until_ready(rope_position_embedding(x1, cos_f32, sin_f32))
    ref1 = rope_reference(x1, emb)
    assert out1.shape == x1.shape
    assert jnp.allclose(out1, ref1, atol=1e-5, rtol=1e-5), "case1 mismatch vs reference"

    # Case 2: multi-block seq grid with a partial (masked) last block.
    x2 = jax.random.normal(jax.random.fold_in(key, 1), (2, 40, DIM), dtype=jnp.float32)
    out2 = jax.block_until_ready(
        rope_position_embedding(x2, cos_f32, sin_f32, seq_tile=16))
    ref2 = rope_reference(x2, emb)
    assert jnp.allclose(out2, ref2, atol=1e-5, rtol=1e-5), "case2 mismatch vs reference"

    # Case 3: batch-tiled blocks (tile_b > 1) with in-kernel table broadcast.
    x3 = jax.random.normal(jax.random.fold_in(key, 2), (4, 16, DIM), dtype=jnp.float32)
    out3 = jax.block_until_ready(
        rope_position_embedding(x3, cos_f32, sin_f32, seq_tile=16, batch_tile=2))
    ref3 = rope_reference(x3, emb)
    assert jnp.allclose(out3, ref3, atol=1e-5, rtol=1e-5), "case3 mismatch vs reference"

    # Case 4: bf16 end to end (tables built once in bf16; loose tolerance).
    cos_bf, sin_bf = build_rope_tables(MAX_SEQ_LEN, DIM, dtype=jnp.bfloat16)
    x4 = jax.random.normal(jax.random.fold_in(key, 3), (2, 32, DIM), dtype=jnp.bfloat16)
    out4 = jax.block_until_ready(rope_position_embedding(x4, cos_bf, sin_bf))
    ref4 = rope_reference(x4.astype(jnp.float32), emb)
    assert jnp.allclose(out4.astype(jnp.float32), ref4, atol=1.5e-1, rtol=5e-2), \
        "case4 (bf16) mismatch vs reference"

    print("KERNEL_OK")
</pallas_src>

<mosaic_0001>
module attributes {stable_mosaic.version = 11 : i64} {
  func.func @_rope_kernel(%arg0: i32, %arg1: i32, %arg2: memref<1x16x128xf32, #tpu.memory_space<vmem>>, %arg3: memref<16x128xf32, #tpu.memory_space<vmem>>, %arg4: memref<16x128xf32, #tpu.memory_space<vmem>>, %arg5: memref<1x16x128xf32, #tpu.memory_space<vmem>>) attributes {dimension_semantics = [#tpu.dimension_semantics<parallel>, #tpu.dimension_semantics<parallel>], iteration_bounds = array<i64: 1, 2>, scalar_prefetch = 0 : i64, scratch_operands = 0 : i64, tpu.core_type = #tpu.core_type<tc>, window_params = [{transform_indices = @transform_0, window_bounds = array<i64: 1, 16, 128>}, {transform_indices = @transform_1, window_bounds = array<i64: 16, 128>}, {transform_indices = @transform_2, window_bounds = array<i64: 16, 128>}, {transform_indices = @transform_3, window_bounds = array<i64: 1, 16, 128>}]} {
    %c0 = arith.constant 0 : index
    %c0_0 = arith.constant 0 : index
    %c0_1 = arith.constant 0 : index
    %0 = vector.load %arg2[%c0, %c0_0, %c0_1] : memref<1x16x128xf32, #tpu.memory_space<vmem>>, vector<1x16x128xf32>
    %1 = vector.extract_strided_slice %0 {offsets = [0, 0, 1], sizes = [1, 16, 127], strides = [1, 1, 1]} : vector<1x16x128xf32> to vector<1x16x127xf32>
    %2 = vector.extract_strided_slice %0 {offsets = [0, 0, 0], sizes = [1, 16, 1], strides = [1, 1, 1]} : vector<1x16x128xf32> to vector<1x16x1xf32>
    %3 = tpu.concatenate %1, %2 in 2 : vector<1x16x127xf32>, vector<1x16x1xf32> -> vector<1x16x128xf32>
    %4 = vector.extract_strided_slice %0 {offsets = [0, 0, 127], sizes = [1, 16, 1], strides = [1, 1, 1]} : vector<1x16x128xf32> to vector<1x16x1xf32>
    %5 = vector.extract_strided_slice %0 {offsets = [0, 0, 0], sizes = [1, 16, 127], strides = [1, 1, 1]} : vector<1x16x128xf32> to vector<1x16x127xf32>
    %6 = tpu.concatenate %4, %5 in 2 : vector<1x16x1xf32>, vector<1x16x127xf32> -> vector<1x16x128xf32>
    %7 = tpu.iota {dimensions = array<i32: 2>} : vector<1x16x128xi32>
    %c2_i32 = arith.constant 2 : i32
    %c0_i32 = arith.constant 0 : i32
    %8 = arith.cmpi eq, %c2_i32, %c0_i32 : i32
    %c1_i32 = arith.constant 1 : i32
    %9 = arith.select %8, %c1_i32, %c2_i32 : i32
    %10 = vector.broadcast %9 : i32 to vector<1x16x128xi32>
    %11 = arith.remsi %7, %10 : vector<1x16x128xi32>
    %c0_i32_2 = arith.constant 0 : i32
    %12 = vector.broadcast %c0_i32_2 : i32 to vector<1x16x128xi32>
    %13 = arith.cmpi ne, %11, %12 : vector<1x16x128xi32>
    %c0_i32_3 = arith.constant 0 : i32
    %14 = vector.broadcast %c0_i32_3 : i32 to vector<1x16x128xi32>
    %15 = arith.cmpi slt, %11, %14 : vector<1x16x128xi32>
    %c0_i32_4 = arith.constant 0 : i32
    %16 = arith.cmpi slt, %9, %c0_i32_4 : i32
    %17 = vector.broadcast %16 : i1 to vector<1x16x128xi1>
    %18 = vector.broadcast %17 : vector<1x16x128xi1> to vector<1x16x128xi1>
    %19 = arith.xori %15, %18 : vector<1x16x128xi1>
    %20 = arith.andi %19, %13 : vector<1x16x128xi1>
    %21 = vector.broadcast %9 : i32 to vector<1x16x128xi32>
    %22 = arith.addi %11, %21 : vector<1x16x128xi32>
    %23 = arith.select %20, %22, %11 : vector<1x16x128xi1>, vector<1x16x128xi32>
    %c0_i32_5 = arith.constant 0 : i32
    %24 = vector.broadcast %c0_i32_5 : i32 to vector<1x16x128xi32>
    %25 = arith.cmpi eq, %23, %24 : vector<1x16x128xi32>
    %26 = arith.select %25, %3, %6 : vector<1x16x128xi1>, vector<1x16x128xf32>
    %c0_6 = arith.constant 0 : index
    %c0_7 = arith.constant 0 : index
    %27 = vector.load %arg3[%c0_6, %c0_7] : memref<16x128xf32, #tpu.memory_space<vmem>>, vector<16x128xf32>
    %28 = vector.shape_cast %27 : vector<16x128xf32> to vector<1x16x128xf32>
    %29 = arith.mulf %0, %28 : vector<1x16x128xf32>
    %c0_8 = arith.constant 0 : index
    %c0_9 = arith.constant 0 : index
    %30 = vector.load %arg4[%c0_8, %c0_9] : memref<16x128xf32, #tpu.memory_space<vmem>>, vector<16x128xf32>
    %31 = vector.shape_cast %30 : vector<16x128xf32> to vector<1x16x128xf32>
    %32 = arith.mulf %26, %31 : vector<1x16x128xf32>
    %33 = arith.addf %29, %32 : vector<1x16x128xf32>
    %c0_10 = arith.constant 0 : index
    %c0_11 = arith.constant 0 : index
    %c0_12 = arith.constant 0 : index
    %34 = vector.load %arg5[%c0_10, %c0_11, %c0_12] : memref<1x16x128xf32, #tpu.memory_space<vmem>>, vector<1x16x128xf32>
    tpu.vector_store %arg5[%c0_10, %c0_11, %c0_12], %33 {strides = array<i32>} : memref<1x16x128xf32, #tpu.memory_space<vmem>>, vector<1x16x128xf32>,
    return
  }
  func.func @transform_0(%arg0: i32, %arg1: i32) -> (i32, i32, i32) {
    %c0_i32 = arith.constant 0 : i32
    %c0_i32_0 = arith.constant 0 : i32
    return %arg1, %arg0, %c0_i32 : i32, i32, i32
  }
  func.func @transform_1(%arg0: i32, %arg1: i32) -> (i32, i32) {
    %c0_i32 = arith.constant 0 : i32
    %c0_i32_0 = arith.constant 0 : i32
    return %arg0, %c0_i32 : i32, i32
  }
  func.func @transform_2(%arg0: i32, %arg1: i32) -> (i32, i32) {
    %c0_i32 = arith.constant 0 : i32
    %c0_i32_0 = arith.constant 0 : i32
    return %arg0, %c0_i32 : i32, i32
  }
  func.func @transform_3(%arg0: i32, %arg1: i32) -> (i32, i32, i32) {
    %c0_i32 = arith.constant 0 : i32
    %c0_i32_0 = arith.constant 0 : i32
    return %arg1, %arg0, %c0_i32 : i32, i32, i32
  }
}

</mosaic_0001>

<bundles_post_ra>
// kernel: tpu_custom_call.1
= control target key start
LH: loop header
LB: loop body
LE: loop exit
PB: predicated region body
PF: predicated region fallthrough
CT: control target
= control target key end

     0   :  { %8 = vsyncpa [#allocation3], 0  ;;  %s918_s0 = inlined_call_operand.hbm [shape: f32[2,16,128], index: 0, kind: input, shape index: {}]   ;;  %s919_s1 = inlined_call_operand.hbm [shape: f32[64,128], index: 1, kind: input, shape index: {}]   ;;  %s920_s2 = inlined_call_operand.hbm [shape: f32[64,128], index: 2, kind: input, shape index: {}]   ;;  %s921_s3 = inlined_call_operand.hbm [shape: f32[2,16,128], index: 3, kind: output, shape index: {}]  }
   0x1   :  { %10 = vsyncpa [#allocation3 + $0x1], 0 }
   0x2   :  { %11 = vsyncpa [#allocation6], 0 }
   0x3   :  { %12 = vsyncpa [#allocation4], 0 }
   0x4   :  { %14 = vsyncpa [#allocation4 + $0x1], 0  ;;  %s751_s12 = smov 0   ;;  %s753_s13 = smov 0  }
   0x5   :  { %s755_s14 = smov 0   ;;  %s757_s15 = smov 0  }
   0x6   :  { %s759_s16 = smov 0   ;;  %s761_s17 = smov 0  }
   0x7 LB: > { %s435_s18 = sadd.s32 4294967295, %s721_s17   ;;  %s436_s19 = sadd.s32 4294967294, %s721_s17   ;;  %s721_s17 = sphi %s761_s17, %s20_s17   ;;  %s717_s16 = sphi %s759_s16, %s933_s16   ;;  %s713_s15 = sphi %s757_s15, %s932_s15   ;;  %s709_s14 = sphi %s755_s14, %s931_s14   ;;  %s705_s13 = sphi %s753_s13, %s930_s13   ;;  %s701_s12 = sphi %s751_s12, %s929_s12  }
   0x8   : > { %p54_p0 = scmp.ne.s32.totalorder %s705_s13, %s701_s12  ;;  %p787_p1 = scmp.eq.s32.totalorder %s435_s18, 0 }
   0x9   : > { %p138_p2 = scmp.eq.s32.totalorder %s436_s19, 1  ;;  %p437_p4 = scmp.ge.s32.totalorder %s721_s17, 1 }
   0xa   : > { %p793_p3 = por %p787_p1, %p54_p0  ;;  %p145_p6 = scmp.lt.s32.totalorder %s721_s17, 3 }
   0xb   : > { %p798_p5 = por %p138_p2, %p54_p0  ;;  %s159_s25 = sshll.u32 %s919_s1, 4  ;;  %s160_s25 = int_to_ptr.hbm [resolvable:$true] %s159_s25 }
   0xc   : > { %p806_p7 = pnand %p437_p4, %p145_p6  ;;  %s723_s27 = smov [#allocation5]  }
   0xd   : > { %s161_s28 = sshll.u32 %s723_s27, 4  ;;  %p440_p10 = scmp.ge.s32.totalorder %s721_s17, 2  ;;  %s162_s28 = int_to_ptr.vmem [resolvable:$true] %s161_s28 }
   0xe   : > { %p468_p8 = pneg %p806_p7  ;;  %s176_s4 = sshll.u32 %s920_s2, 4  ;;  %s177_s4 = int_to_ptr.hbm [resolvable:$true] %s176_s4 }
   0xf   : > { %s724_s5 = smov 128   ;;  %s725_s6 = smov 8  }
  0x10   : > { %p469_p9 = pnand %p468_p8, %p787_p1  ;;  %s726_s7 = smov [#allocation7]  }
  0x11   : > { %s178_s8 = sshll.u32 %s726_s7, 4  ;;  %p132_p11 = scmp.eq.s32.totalorder %s435_s18, 1  ;;  %s179_s8 = int_to_ptr.vmem [resolvable:$true] %s178_s8 }
  0x12   : > { %471 = dma.hbm_to_vmem [thread:$0]  (!%p469_p9), %s160_s25, 256, %s162_s28, [#allocation6], %s724_s5, %s724_s5, %s725_s6  }
  0x13   : > { %474 = dma.hbm_to_vmem [thread:$0]  (!%p469_p9), %s177_s4, 256, %s179_s8, [#allocation6], %s724_s5, %s724_s5, %s725_s6  }
  0x14   : > { %s29_s9 = sadd.s32 1, %s717_s16  ;;  %s41_s10 = sadd.s32 1, %s709_s14 }
  0x15   : > { %p30_p12 = scmp.ge.s32.totalorder %s29_s9, 2  ;;  %p48_p13 = scmp.ne.s32.totalorder %s709_s14, %s705_s13 }
  0x16   : > { %p49_p0 = scmp.eq.s32.totalorder %s721_s17, 0  ;;  %p485_p4 = scmp.lt.s32.totalorder %s721_s17, 2 }
  0x17   : > { %s935_s9 = smov (%p30_p12, %s29_s9), 0  ;;  %p833_p2 = por %p132_p11, %p48_p13 }
  0x18   : > { %s36_s19 = ssub.s32 %s717_s16, %s935_s9  ;;  %s192_s23 = sand.u32 1, %s709_s14  }
  0x19   : > { %p39_p6 = scmp.eq.s32.totalorder %s36_s19, 0  ;;  %p50_p8 = por %p49_p0, %p48_p13 }
  0x1a   : > { %s441_s24 = sshll.u32 %s192_s23, 4  ;;  %s454_s18 = sshll.u32 %s717_s16, 4 }
  0x1b   : > { %s843_s25 = scalar_select %p39_p6, %s709_s14, %s41_s10  }
  0x1c   : > { %s203_s29 = scalar_lea.hbm %s918_s0, %s454_s18  ;;  %s196_s4 = scalar_lea.vmem [#allocation2], %s441_s24 }
  0x1d   : > { %s204_s30 = sshll.u32 %s203_s29, 4  ;;  %s206_s7 = sshll.u32 %s196_s4, 4  ;;  %s205_s30 = int_to_ptr.hbm [resolvable:$true] %s204_s30  ;;  %s207_s7 = int_to_ptr.vmem [resolvable:$true] %s206_s7 }
  0x1e   : > { %p476_p9 = pnand %p485_p4, %p50_p8  ;;  %s193_s8 = scalar_lea.sflag [#allocation3], %s192_s23 }
  0x1f   : > { %218 = sbr.rel (%p806_p7) target bundleno = 172 (0xac), region = 32  ;;  %s856_s10 = sand.u32 (!%p806_p7), 1, %s705_s13  }
  0x20   : > { %478 = dma.hbm_to_vmem [thread:$0]  (!%p476_p9), %s205_s30, 256, %s207_s7, %s193_s8, %s724_s5, %s724_s5, %s725_s6  }
  0x21   : > { %s445_s19 = sshll.u32 (!%p806_p7), %s856_s10, 4  ;;  %s221_s24 = scalar_lea.sflag (!%p806_p7), [#allocation3], %s856_s10 }
  0x22   : > { %s224_s18 = scalar_lea.vmem (!%p806_p7), [#allocation2], %s445_s19 }
  0x24   : > { %688 = dma.done.wait (%p793_p3), %s221_s24, 256  }
  0x25   : > { %690 = vsyncadd (%p793_p3), %s221_s24, 4294967040 }
  0x26   : > { %692 = dma.done.wait (%p787_p1), [#allocation6], 512  }
  0x27   : > { %694 = vsyncadd (%p787_p1), [#allocation6], 4294966784  ;;  %v262_v0 = vld [vmem:[%s224_s18] sm:$0xff]  ;;  %s727_s26 = smov 1   ;;  %s728_s5 = smov 127   ;;  %v263_v1 = vld [vmem:[%s224_s18 + $0x8] sm:$0xff]  ;;  %v278_v2 = vlaneseq }
  0x28   : > { %272 = vrot.lane.b32.xlu1 %v262_v0, %s727_s26  ;;  %266 = vrot.lane.b32.xlu0 %v262_v0, %s728_s5  ;;  %v295_v5 = vld [vmem:[#allocation5] sm:$0xff]  ;;  %v299_v7 = vld [vmem:[#allocation7] sm:$0xff]  ;;  %s455_s20 = sshll.u32 %s713_s15, 4  ;;  %v296_v14 = vld [vmem:[#allocation5 + $0x8] sm:$0xff]  ;;  %s257_s27 = scalar_lea.vmem [#allocation8], %s445_s19 }
  0x29   : > { %v279_v3 = vand.u32 127, %v278_v2  ;;  %v297_v8 = vmul.f32 %v295_v5, %v262_v0  ;;  %s321_s23 = scalar_lea.hbm %s921_s3, %s455_s20  ;;  %s322_s28 = sshll.u32 %s257_s27, 4  ;;  %v300_v15 = vld [vmem:[#allocation7 + $0x8] sm:$0xff]  ;;  %v298_v16 = vmul.f32 %v296_v14, %v263_v1  ;;  %s323_s28 = int_to_ptr.vmem [resolvable:$true] %s322_s28 }
  0x2a   : > { %s324_s29 = sshll.u32 %s321_s23, 4  ;;  %s308_s15 = scalar_lea.sflag [#allocation4], %s856_s10  ;;  %s325_s29 = int_to_ptr.hbm [resolvable:$true] %s324_s29 }
  0x2b   : > { %v284_v4 = vand.u32 1, %v279_v3  ;;  %s649_s30 = sshra.s32 %s325_s29, 4  ;;  %s655_s19 = scalar_lea.hbm %s921_s3, 32  ;;  %s650_s30 = int_to_ptr.hbm [resolvable:$true] %s649_s30 }
  0x2c   : > { %s651_s4 = scalar_lea.hbm %s650_s30, 16  ;;  %p656_p11 = scmp.lt.s32.totalorder %s650_s30, %s921_s3 }
  0x2d   : > { %vm870_vm0 = vcmp.eq.s32.totalorder %v284_v4, 0  ;;  %p652_p1 = scmp.ne.s32.totalorder %s650_s30, %s651_s4  ;;  %p657_p12 = scmp.lt.s32.totalorder %s655_s19, %s651_s4 }
  0x2f   : > { %p653_p3 = pnand %p652_p1, %p833_p2  ;;  %p658_p13 = por %p657_p12, %p656_p11 }
  0x30   : > { %274 = vrot.lane.b32.xlu1 %v263_v1, %s727_s26  ;;  %268 = vrot.lane.b32.xlu0 %v263_v1, %s728_s5 }
  0x31   : > { %p654_p7 = pneg %p653_p3 }
  0x33   : > { %p659_p0 = pnand %p658_p13, %p654_p7 }
  0x9a   : > { %v273_v9 = vpop.permute.xlu1 %272  ;;  %v267_v10 = vpop.permute.xlu0 %266 }
  0x9b   : > { %v293_v11 = vsel %vm870_vm0, %v267_v10, %v273_v9 }
  0x9c   : > { %v301_v12 = vmul.f32 %v299_v7, %v293_v11 }
  0x9e   : > { %v303_v13 = vadd.f32 %v301_v12, %v297_v8 }
  0xa0   : > { %305 = vst [vmem:[%s257_s27] sm:$0xff] %v303_v13 }
  0xa2   : > { %v275_v17 = vpop.permute.xlu1 %274  ;;  %v269_v18 = vpop.permute.xlu0 %268 }
  0xa3   : > { %v294_v19 = vsel %vm870_vm0, %v269_v18, %v275_v17 }
  0xa4   : > { %v302_v20 = vmul.f32 %v300_v15, %v294_v19 }
  0xa6   : > { %v304_v21 = vadd.f32 %v302_v20, %v298_v16 }
  0xa8   : > { %306 = vst [vmem:[%s257_s27 + $0x8] sm:$0xff] %v304_v21 }
  0xa9   : > { %662 = shalt.err (!%p659_p0)
}
  0xaa   : > { %s729_s10 = smov 128   ;;  %s730_s26 = smov 8  }
  0xab   : > { %466 = dma.vmem_to_hbm [thread:$0]  (%p833_p2), %s323_s28, 256, %s325_s29, %s308_s15, %s729_s10, %s729_s10, %s730_s26  }
  0xac PF: > { %s339_s5 = sand.u32 1, %s701_s12   ;;  %p480_p4 = pnand %p440_p10, %p798_p5 }
  0xad   : > { %s340_s20 = scalar_lea.sflag [#allocation4], %s339_s5 }
  0xae   : > { %p481_p6 = pneg %p480_p4 }
  0xb0   : > { %696 = dma.done.wait (%p481_p6), %s340_s20, 256  }
  0xb1   : > { %698 = vsyncadd (%p481_p6), %s340_s20, 4294967040  ;;  %s20_s17 = sadd.s32 1, %s721_s17   ;;  %s929_s12 = smov %s705_s13 }
  0xb2   : > { %p17_p8 = scmp.ge.s32.totalorder %s20_s17, 4   ;;  %s930_s13 = smov %s709_s14 }
  0xb3   : > { %s931_s14 = smov %s843_s25  ;;  %s932_s15 = smov %s717_s16 }
  0xb4   : > { %s933_s16 = smov %s935_s9  ;;  %19 = sbr.rel (!%p17_p8) target bundleno = 7 (0x7), region = 87 }
  0xb9   :  { %346 = vsyncpa [#allocation3], 1 }
  0xba   :  { %348 = vsyncpa [#allocation3 + $0x1], 1 }
  0xbb   :  { %349 = vsyncpa [#allocation6], 1 }
  0xbc   :  { %350 = vsyncpa [#allocation4], 1 }
  0xbd   :  { %352 = vsyncpa [#allocation4 + $0x1], 1 }

</bundles_post_ra>
